<compile_context>
chip_gen: v6e
topology: v6e:2x2x1
jax: 0.10.0
libtpu: 0.0.40
codegen_flags: <defaults>
</compile_context>

<pallas_src>
import jax
import jax.numpy as jnp
from jax.experimental import pallas as pl
from jax.experimental.pallas import tpu as pltpu

LEAKY_SLOPE = 0.01   # F.leaky_relu default negative_slope
BN_EPS = 1e-5        # nn.BatchNorm1d default eps
PAD = 128            # TPU lane width: node dim + feature dims padded to this


def facenet_kernel(a_ref, x_ref, w_ref, b_ref, o_ref):
    """Fused facenet forward: (mean-SAGEConv + folded-BN + leaky_relu) x 2.

    a_ref : [P, P]       dense adjacency, zero-padded (row i = in-neighbors of i)
    x_ref : [P, P]       node features, zero-padded
    w_ref : [2, 2*P, P]  per-layer BN-folded stacked weights [[W_self],[W_neigh]]
    b_ref : [2, P]       per-layer BN-folded bias
    o_ref : [P, P]       layer-2 output (lane-dense)
    """
    p = w_ref.shape[2]
    a = a_ref[...]

    # In-degree; normalize the adjacency ONCE (shared by both layers) so mean
    # aggregation per layer is just an MXU matmul.  Exact reciprocal (cheap at
    # [P,1]); zero-degree / padded rows get 0.
    deg = jnp.sum(a, axis=-1, keepdims=True)                       # [P, 1]
    deg_inv = jnp.where(deg > 0.0, 1.0 / jnp.maximum(deg, 1.0), 0.0)
    a = a * deg_inv                                                # row-normalized

    def sage_layer(x, w_self, w_neigh, b):
        neigh = jnp.dot(a, x, preferred_element_type=jnp.float32)  # mean agg (MXU)
        h = (jnp.dot(x, w_self, preferred_element_type=jnp.float32)
             + jnp.dot(neigh, w_neigh, preferred_element_type=jnp.float32)
             + b)
        return jnp.maximum(h, LEAKY_SLOPE * h)                     # leaky_relu

    h1 = sage_layer(x_ref[...],
                    w_ref[0, 0:p, :], w_ref[0, p:2 * p, :], b_ref[0:1, :])
    o_ref[...] = sage_layer(h1,
                            w_ref[1, 0:p, :], w_ref[1, p:2 * p, :], b_ref[1:2, :])


def _fold_bn(w_self, w_neigh, bias, gamma, beta, rmean, rvar):
    """Fold BatchNorm1d(eval) into the SAGEConv weights/bias (exact)."""
    scale = gamma * jax.lax.rsqrt(rvar + BN_EPS)                   # [1, H]
    return w_self * scale, w_neigh * scale, (bias - rmean) * scale + beta


def prepare_facenet(adj, x, params, pad=PAD):
    """One-time prep (outside the jit'd per-call path): fold BN, stack + pad
    weights/bias, lane-pad the adjacency and features.  All padding is exact."""
    n, in_dim = x.shape
    hidden = params["w1_self"].shape[1]
    assert n <= pad and in_dim <= pad and hidden <= pad  # single 128-wide block

    def pack(ws, wn, b):
        w = jnp.zeros((2 * pad, pad), jnp.float32)
        w = w.at[:ws.shape[0], :ws.shape[1]].set(ws)
        w = w.at[pad:pad + wn.shape[0], :wn.shape[1]].set(wn)
        bb = jnp.zeros((1, pad), jnp.float32).at[:, :b.shape[1]].set(b)
        return w, bb

    w1s, w1n, b1 = _fold_bn(params["w1_self"], params["w1_neigh"], params["b1"],
                            params["g1"], params["beta1"],
                            params["rm1"], params["rv1"])
    w2s, w2n, b2 = _fold_bn(params["w2_self"], params["w2_neigh"], params["b2"],
                            params["g2"], params["beta2"],
                            params["rm2"], params["rv2"])
    w1p, b1p = pack(w1s, w1n, b1)
    w2p, b2p = pack(w2s, w2n, b2)
    w_p = jnp.stack([w1p, w2p])                                    # [2, 2P, P]
    b_p = jnp.concatenate([b1p, b2p], axis=0)                      # [2, P]

    adj_p = jnp.zeros((pad, pad), jnp.float32).at[:n, :n].set(adj)
    x_p = jnp.zeros((pad, pad), jnp.float32).at[:n, :in_dim].set(x)
    return adj_p, x_p, w_p, b_p


def facenet_forward(adj_p, x_p, w_p, b_p):
    """Just the pallas_call (all folding/padding hoisted to prepare_facenet)."""
    n_p, p = x_p.shape
    # Advisory cost = actual padded kernel work (2 layers: 1 agg + 2 proj matmuls).
    flops = 2 * (2 * n_p * n_p * p + 2 * (2 * n_p * p * p))
    bytes_accessed = 4 * (adj_p.size + x_p.size + w_p.size + b_p.size + n_p * p)
    cost = pl.CostEstimate(flops=flops, transcendentals=0,
                           bytes_accessed=bytes_accessed)

    vmem = pl.BlockSpec(memory_space=pltpu.MemorySpace.VMEM)
    return pl.pallas_call(
        facenet_kernel,
        out_shape=jax.ShapeDtypeStruct((n_p, p), jnp.float32),
        in_specs=[vmem] * 4,
        out_specs=vmem,
        cost_estimate=cost,
    )(adj_p, x_p, w_p, b_p)


def glorot(key, shape):
    fan_in, fan_out = shape
    limit = jnp.sqrt(6.0 / (fan_in + fan_out))
    return jax.random.uniform(key, shape, jnp.float32, -limit, limit)


if __name__ == "__main__":
    N, IN_DIM, HIDDEN = 16, 8, 32

    key = jax.random.PRNGKey(0)
    keys = jax.random.split(key, 6)

    # Node features and a deterministic random graph (dense adjacency, self loops).
    x = jax.random.normal(keys[0], (N, IN_DIM), jnp.float32)
    adj = (jax.random.uniform(keys[1], (N, N)) < 0.3).astype(jnp.float32)
    adj = jnp.maximum(adj, jnp.eye(N, dtype=jnp.float32))  # no zero-degree nodes

    params = {
        # layer 1: SAGEConv(in_dim -> hidden) + BatchNorm1d(hidden)
        "w1_self":  glorot(keys[2], (IN_DIM, HIDDEN)),
        "w1_neigh": glorot(keys[3], (IN_DIM, HIDDEN)),
        "b1": jnp.zeros((1, HIDDEN), jnp.float32),
        "g1": jnp.ones((1, HIDDEN), jnp.float32),
        "beta1": jnp.zeros((1, HIDDEN), jnp.float32),
        "rm1": jnp.zeros((1, HIDDEN), jnp.float32),
        "rv1": jnp.ones((1, HIDDEN), jnp.float32),
        # layer 2: SAGEConv(hidden -> hidden) + BatchNorm1d(hidden)
        "w2_self":  glorot(keys[4], (HIDDEN, HIDDEN)),
        "w2_neigh": glorot(keys[5], (HIDDEN, HIDDEN)),
        "b2": jnp.zeros((1, HIDDEN), jnp.float32),
        "g2": jnp.ones((1, HIDDEN), jnp.float32),
        "beta2": jnp.zeros((1, HIDDEN), jnp.float32),
        "rm2": jnp.zeros((1, HIDDEN), jnp.float32),
        "rv2": jnp.ones((1, HIDDEN), jnp.float32),
    }

    # One-time prep (inference constants + static graph) outside the jit path.
    adj_p, x_p, w_p, b_p = prepare_facenet(adj, x, params)

    fwd = jax.jit(facenet_forward)
    out_p = fwd(adj_p, x_p, w_p, b_p)
    jax.block_until_ready(out_p)

    out = out_p[:N, :HIDDEN]
    assert out.shape == (N, HIDDEN), out.shape
    print("KERNEL_OK")
</pallas_src>

<mosaic_0001>
module attributes {stable_mosaic.version = 11 : i64} {
  func.func @facenet_kernel(%arg0: memref<128x128xf32, #tpu.memory_space<vmem>>, %arg1: memref<128x128xf32, #tpu.memory_space<vmem>>, %arg2: memref<2x256x128xf32, #tpu.memory_space<vmem>>, %arg3: memref<2x128xf32, #tpu.memory_space<vmem>>, %arg4: memref<128x128xf32, #tpu.memory_space<vmem>>) attributes {dimension_semantics = [], scalar_prefetch = 0 : i64, scratch_operands = 0 : i64, tpu.core_type = #tpu.core_type<tc>} {
    %c0 = arith.constant 0 : index
    %c0_0 = arith.constant 0 : index
    %0 = vector.load %arg0[%c0, %c0_0] : memref<128x128xf32, #tpu.memory_space<vmem>>, vector<128x128xf32>
    %cst = arith.constant dense<0.000000e+00> : vector<128xf32>
    %1 = vector.multi_reduction <add>, %0, %cst [1] : vector<128x128xf32> to vector<128xf32>
    %2 = vector.shape_cast %1 : vector<128xf32> to vector<128x1xf32>
    %cst_1 = arith.constant 0.000000e+00 : f32
    %3 = vector.broadcast %cst_1 : f32 to vector<128x1xf32>
    %4 = arith.cmpf ogt, %2, %3 : vector<128x1xf32>
    %cst_2 = arith.constant 1.000000e+00 : f32
    %5 = vector.broadcast %cst_2 : f32 to vector<128x1xf32>
    %6 = arith.maximumf %2, %5 : vector<128x1xf32>
    %cst_3 = arith.constant 1.000000e+00 : f32
    %7 = vector.broadcast %cst_3 : f32 to vector<128x1xf32>
    %8 = arith.divf %7, %6 : vector<128x1xf32>
    %cst_4 = arith.constant 0.000000e+00 : f32
    %9 = vector.broadcast %cst_4 : f32 to vector<128x1xf32>
    %10 = arith.select %4, %8, %9 : vector<128x1xi1>, vector<128x1xf32>
    %11 = vector.broadcast %10 : vector<128x1xf32> to vector<128x128xf32>
    %12 = arith.mulf %0, %11 : vector<128x128xf32>
    %c0_5 = arith.constant 0 : index
    %c0_6 = arith.constant 0 : index
    %13 = vector.load %arg1[%c0_5, %c0_6] : memref<128x128xf32, #tpu.memory_space<vmem>>, vector<128x128xf32>
    %c0_7 = arith.constant 0 : index
    %c0_8 = arith.constant 0 : index
    %c0_9 = arith.constant 0 : index
    %14 = vector.load %arg2[%c0_7, %c0_8, %c0_9] : memref<2x256x128xf32, #tpu.memory_space<vmem>>, vector<1x128x128xf32>
    %15 = vector.shape_cast %14 : vector<1x128x128xf32> to vector<128x128xf32>
    %c0_10 = arith.constant 0 : index
    %c128 = arith.constant 128 : index
    %c0_11 = arith.constant 0 : index
    %16 = vector.load %arg2[%c0_10, %c128, %c0_11] : memref<2x256x128xf32, #tpu.memory_space<vmem>>, vector<1x128x128xf32>
    %17 = vector.shape_cast %16 : vector<1x128x128xf32> to vector<128x128xf32>
    %c0_12 = arith.constant 0 : index
    %c0_13 = arith.constant 0 : index
    %18 = vector.load %arg3[%c0_12, %c0_13] : memref<2x128xf32, #tpu.memory_space<vmem>>, vector<1x128xf32>
    %cst_14 = arith.constant dense<0.000000e+00> : vector<128x128xf32>
    %19 = tpu.matmul %12, %13, %cst_14 {dimension_numbers = #tpu.dot_dimension_numbers<[1], [0], [0], [1], [0, 0, 1, 1], [], []>} : vector<128x128xf32>, vector<128x128xf32>, vector<128x128xf32> -> vector<128x128xf32>
    %cst_15 = arith.constant dense<0.000000e+00> : vector<128x128xf32>
    %20 = tpu.matmul %13, %15, %cst_15 {dimension_numbers = #tpu.dot_dimension_numbers<[1], [0], [0], [1], [0, 0, 1, 1], [], []>} : vector<128x128xf32>, vector<128x128xf32>, vector<128x128xf32> -> vector<128x128xf32>
    %cst_16 = arith.constant dense<0.000000e+00> : vector<128x128xf32>
    %21 = tpu.matmul %19, %17, %cst_16 {dimension_numbers = #tpu.dot_dimension_numbers<[1], [0], [0], [1], [0, 0, 1, 1], [], []>} : vector<128x128xf32>, vector<128x128xf32>, vector<128x128xf32> -> vector<128x128xf32>
    %22 = arith.addf %20, %21 : vector<128x128xf32>
    %23 = vector.broadcast %18 : vector<1x128xf32> to vector<128x128xf32>
    %24 = arith.addf %22, %23 : vector<128x128xf32>
    %cst_17 = arith.constant 0.00999999977 : f32
    %25 = vector.broadcast %cst_17 : f32 to vector<128x128xf32>
    %26 = arith.mulf %25, %24 : vector<128x128xf32>
    %27 = arith.maximumf %24, %26 : vector<128x128xf32>
    %c1 = arith.constant 1 : index
    %c0_18 = arith.constant 0 : index
    %c0_19 = arith.constant 0 : index
    %28 = vector.load %arg2[%c1, %c0_18, %c0_19] : memref<2x256x128xf32, #tpu.memory_space<vmem>>, vector<1x128x128xf32>
    %29 = vector.shape_cast %28 : vector<1x128x128xf32> to vector<128x128xf32>
    %c1_20 = arith.constant 1 : index
    %c128_21 = arith.constant 128 : index
    %c0_22 = arith.constant 0 : index
    %30 = vector.load %arg2[%c1_20, %c128_21, %c0_22] : memref<2x256x128xf32, #tpu.memory_space<vmem>>, vector<1x128x128xf32>
    %31 = vector.shape_cast %30 : vector<1x128x128xf32> to vector<128x128xf32>
    %c1_23 = arith.constant 1 : index
    %c0_24 = arith.constant 0 : index
    %32 = vector.load %arg3[%c1_23, %c0_24] : memref<2x128xf32, #tpu.memory_space<vmem>>, vector<1x128xf32>
    %cst_25 = arith.constant dense<0.000000e+00> : vector<128x128xf32>
    %33 = tpu.matmul %12, %27, %cst_25 {dimension_numbers = #tpu.dot_dimension_numbers<[1], [0], [0], [1], [0, 0, 1, 1], [], []>} : vector<128x128xf32>, vector<128x128xf32>, vector<128x128xf32> -> vector<128x128xf32>
    %cst_26 = arith.constant dense<0.000000e+00> : vector<128x128xf32>
    %34 = tpu.matmul %27, %29, %cst_26 {dimension_numbers = #tpu.dot_dimension_numbers<[1], [0], [0], [1], [0, 0, 1, 1], [], []>} : vector<128x128xf32>, vector<128x128xf32>, vector<128x128xf32> -> vector<128x128xf32>
    %cst_27 = arith.constant dense<0.000000e+00> : vector<128x128xf32>
    %35 = tpu.matmul %33, %31, %cst_27 {dimension_numbers = #tpu.dot_dimension_numbers<[1], [0], [0], [1], [0, 0, 1, 1], [], []>} : vector<128x128xf32>, vector<128x128xf32>, vector<128x128xf32> -> vector<128x128xf32>
    %36 = arith.addf %34, %35 : vector<128x128xf32>
    %37 = vector.broadcast %32 : vector<1x128xf32> to vector<128x128xf32>
    %38 = arith.addf %36, %37 : vector<128x128xf32>
    %cst_28 = arith.constant 0.00999999977 : f32
    %39 = vector.broadcast %cst_28 : f32 to vector<128x128xf32>
    %40 = arith.mulf %39, %38 : vector<128x128xf32>
    %41 = arith.maximumf %38, %40 : vector<128x128xf32>
    %c0_29 = arith.constant 0 : index
    %c0_30 = arith.constant 0 : index
    %42 = vector.load %arg4[%c0_29, %c0_30] : memref<128x128xf32, #tpu.memory_space<vmem>>, vector<128x128xf32>
    tpu.vector_store %arg4[%c0_29, %c0_30], %41 {strides = array<i32>} : memref<128x128xf32, #tpu.memory_space<vmem>>, vector<128x128xf32>,
    return
  }
}

</mosaic_0001>

<bundles_post_ra>
// kernel: facenet_forward.1
= control target key start
LH: loop header
LB: loop body
LE: loop exit
PB: predicated region body
PF: predicated region fallthrough
CT: control target
= control target key end

     0   :  { %9 = vsyncpa [#allocation3], 0  ;;  %s2431_s0 = inlined_call_operand.hbm [shape: f32[128,128], index: 0, kind: input, shape index: {}]   ;;  %s2432_s1 = inlined_call_operand.hbm [shape: f32[128,128], index: 1, kind: input, shape index: {}]   ;;  %s2433_s2 = inlined_call_operand.hbm [shape: f32[2,256,128], index: 2, kind: input, shape index: {}]   ;;  %s2434_s3 = inlined_call_operand.vmem [shape: f32[2,128], index: 3, kind: input, shape index: {}]   ;;  %s2435_s4 = inlined_call_operand.hbm [shape: f32[128,128], index: 4, kind: output, shape index: {}]  }
   0x1   :  { %10 = vsyncpa [#allocation6], 0 }
   0x2   :  { %11 = vsyncpa [#allocation4], 0  ;;  %s1948_s15 = smov [#allocation5]   ;;  %s1949_s17 = smov [#allocation2]  }
   0x3   :  { %s29_s16 = sshll.u32 %s1948_s15, 4  ;;  %s17_s18 = sshll.u32 %s1949_s17, 4  ;;  %s30_s16 = int_to_ptr.vmem [resolvable:$true] %s29_s16  ;;  %s18_s18 = int_to_ptr.vmem [resolvable:$true] %s17_s18 }
   0x4   :  { %s1870_s19 = scalar_lea.vmem %s30_s16, 2048  ;;  %p1875_p1 = scmp.lt.s32.totalorder %s30_s16, %s30_s16 }
   0x5   :  { %p1871_p0 = scmp.ne.s32.totalorder %s30_s16, %s1870_s19  ;;  %p1876_p2 = scmp.lt.s32.totalorder %s1870_s19, %s1870_s19 }
   0x7   :  { %p1877_p3 = por %p1876_p2, %p1875_p1 }
   0x9   :  { %p1878_p4 = pnand %p1877_p3, %p1871_p0 }
   0xb   :  { %1881 = shalt.err (!%p1878_p4)
}
   0xc   :  { %s1950_s20 = smov 128   ;;  %s1951_s21 = smov 8  }
   0xd   :  { %35 = dma.hbm_to_vmem [thread:$0]  %s2432_s1, 2048, %s30_s16, [#allocation6], %s1950_s20, %s1950_s20, %s1951_s21  }
   0xe   :  { %s1890_s24 = scalar_lea.vmem %s18_s18, 2048  ;;  %p1895_p6 = scmp.lt.s32.totalorder %s18_s18, %s18_s18 }
   0xf   :  { %p1891_p5 = scmp.ne.s32.totalorder %s18_s18, %s1890_s24  ;;  %p1896_p7 = scmp.lt.s32.totalorder %s1890_s24, %s1890_s24 }
  0x11   :  { %p1897_p8 = por %p1896_p7, %p1895_p6 }
  0x13   :  { %p1898_p9 = pnand %p1897_p8, %p1891_p5 }
  0x15   :  { %1901 = shalt.err (!%p1898_p9)
}
  0x16   :  { %23 = dma.hbm_to_vmem [thread:$0]  %s2431_s0, 2048, %s18_s18, [#allocation3], %s1950_s20, %s1950_s20, %s1951_s21  }
  0x17   :  { %s1952_s27 = smov [#allocation7]  }
  0x18   :  { %s41_s28 = sshll.u32 %s1952_s27, 4  ;;  %s42_s28 = int_to_ptr.vmem [resolvable:$true] %s41_s28 }
  0x19   :  { %s1910_s29 = scalar_lea.vmem %s42_s28, 8192  ;;  %p1915_p11 = scmp.lt.s32.totalorder %s42_s28, %s42_s28 }
  0x1a   :  { %p1911_p10 = scmp.ne.s32.totalorder %s42_s28, %s1910_s29  ;;  %p1916_p12 = scmp.lt.s32.totalorder %s1910_s29, %s1910_s29 }
  0x1c   :  { %p1917_p13 = por %p1916_p12, %p1915_p11 }
  0x1e   :  { %p1918_p0 = pnand %p1917_p13, %p1911_p10 }
  0x20   :  { %1921 = shalt.err (!%p1918_p0)
}
  0x21   :  { %47 = dma.hbm_to_vmem [thread:$0]  %s2433_s2, 8192, %s42_s28, [#allocation6], %s1950_s20, %s1950_s20, %s1951_s21  }
  0x22   :  { %1942 = dma.done.wait [#allocation3], 2048  }
  0x23   :  { %1943 = vsyncadd [#allocation3], 4294965248 }
  0x24   :  { %1944 = dma.done.wait [#allocation6], 10240  }
  0x25   :  { %1945 = vsyncadd [#allocation6], 4294957056  ;;  %v1997_v0 = vld [vmem:[#allocation2 + $0x10] sm:$0xff]  ;;  %v1999_v1 = vld [vmem:[#allocation2] sm:$0xff] }
  0x26   :  { %79 = vadd.xlane.f32.xlu1 %v1997_v0  ;;  %75 = vadd.xlane.f32.xlu0 %v1999_v1  ;;  %v2003_v2 = vld [vmem:[#allocation2 + $0x18] sm:$0xff]  ;;  %v2005_v3 = vld [vmem:[#allocation2 + $0x8] sm:$0xff]  ;;  %v2011_v5 = vld [vmem:[#allocation5 + $0x70] sm:$0xff] }
  0x27   :  { %v2009_v4 = vld [vmem:[#allocation5 + $0x78] sm:$0xff]  ;;  %v2013_v6 = vld [vmem:[#allocation2 + $0x28] sm:$0xff]  ;;  %v2015_v7 = vld [vmem:[#allocation2 + $0x20] sm:$0xff] }
  0x28   :  { %1488 = vmatprep.subr.mxu0 %v2009_v4  ;;  %v2020_v8 = vld [vmem:[#allocation5 + $0x68] sm:$0xff]  ;;  %v2024_v9 = vld [vmem:[#allocation2 + $0x38] sm:$0xff]  ;;  %v2026_v10 = vld [vmem:[#allocation2 + $0x30] sm:$0xff] }
  0x29   :  { %1489 = vmatpush3.msra.mxu0 %v2009_v4  ;;  %v2030_v11 = vld [vmem:[#allocation5 + $0x60] sm:$0xff]  ;;  %v2035_v12 = vld [vmem:[#allocation5 + $0x58] sm:$0xff]  ;;  %v2037_v13 = vld [vmem:[#allocation2 + $0x48] sm:$0xff] }
  0x2a   :  { %81 = vadd.xlane.f32.xlu1 %v2003_v2  ;;  %77 = vadd.xlane.f32.xlu0 %v2005_v3  ;;  %v2039_v14 = vld [vmem:[#allocation2 + $0x40] sm:$0xff]  ;;  %v2044_v15 = vld [vmem:[#allocation5 + $0x50] sm:$0xff]  ;;  %v2048_v16 = vld [vmem:[#allocation2 + $0x58] sm:$0xff] }
  0x2b   :  { %1490 = vmatprep.subr.mxu0 %v2011_v5  ;;  %v2050_v17 = vld [vmem:[#allocation2 + $0x50] sm:$0xff]  ;;  %v2054_v18 = vld [vmem:[#allocation5 + $0x48] sm:$0xff]  ;;  %v2059_v19 = vld [vmem:[#allocation5 + $0x40] sm:$0xff] }
  0x2c   :  { %1491 = vmatpush3.msra.mxu0 %v2011_v5  ;;  %v2061_v20 = vld [vmem:[#allocation2 + $0x68] sm:$0xff]  ;;  %v2063_v21 = vld [vmem:[#allocation2 + $0x60] sm:$0xff]  ;;  %v2068_v22 = vld [vmem:[#allocation5 + $0x38] sm:$0xff] }
  0x2d   :  { %1492 = vmatprep.subr.mxu0 %v2020_v8  ;;  %v2072_v23 = vld [vmem:[#allocation2 + $0x78] sm:$0xff]  ;;  %v2074_v24 = vld [vmem:[#allocation2 + $0x70] sm:$0xff]  ;;  %v2083_v26 = vld [vmem:[#allocation5 + $0x28] sm:$0xff] }
  0x2e   :  { %85 = vadd.xlane.f32.xlu1 %v2013_v6  ;;  %83 = vadd.xlane.f32.xlu0 %v2015_v7  ;;  %v2078_v25 = vld [vmem:[#allocation5 + $0x30] sm:$0xff]  ;;  %v2087_v27 = vld [vmem:[#allocation5 + $0x20] sm:$0xff]  ;;  %v2091_v28 = vld [vmem:[#allocation5 + $0x18] sm:$0xff] }
  0x2f   :  { %1493 = vmatpush3.msra.mxu0 %v2020_v8  ;;  %v2095_v29 = vld [vmem:[#allocation5 + $0x10] sm:$0xff]  ;;  %v2099_v30 = vld [vmem:[#allocation5 + $0x8] sm:$0xff]  ;;  %v2103_v31 = vld [vmem:[#allocation5] sm:$0xff] }
  0x30   :  { %1494 = vmatprep.subr.mxu0 %v2030_v11  ;;  %v2109_v32 = vld [vmem:[#allocation7 + $0x78] sm:$0xff]  ;;  %v249_v34 = vld [vmem:[#allocation7 + $0xf0] sm:$0xff]  ;;  %v248_v35 = vld [vmem:[#allocation7 + $0xe8] sm:$0xff] }
  0x31   :  { %1495 = vmatpush3.msra.mxu0 %v2030_v11  ;;  %v250_v33 = vld [vmem:[#allocation7 + $0xf8] sm:$0xff]  ;;  %v247_v36 = vld [vmem:[#allocation7 + $0xe0] sm:$0xff]  ;;  %v245_v38 = vld [vmem:[#allocation7 + $0xd0] sm:$0xff] }
  0x32   :  { %89 = vadd.xlane.f32.xlu1 %v2024_v9  ;;  %87 = vadd.xlane.f32.xlu0 %v2026_v10  ;;  %v246_v37 = vld [vmem:[#allocation7 + $0xd8] sm:$0xff]  ;;  %v244_v39 = vld [vmem:[#allocation7 + $0xc8] sm:$0xff]  ;;  %v243_v40 = vld [vmem:[#allocation7 + $0xc0] sm:$0xff] }
  0x33   :  { %1496 = vmatprep.subr.mxu0 %v2035_v12  ;;  %1544 = vmatprep.subr.mxu1 %v250_v33  ;;  %v242_v41 = vld [vmem:[#allocation7 + $0xb8] sm:$0xff]  ;;  %v241_v42 = vld [vmem:[#allocation7 + $0xb0] sm:$0xff]  ;;  %v240_v43 = vld [vmem:[#allocation7 + $0xa8] sm:$0xff] }
  0x34   :  { %1497 = vmatpush3.msra.mxu0 %v2035_v12  ;;  %1545 = vmatpush3.msra.mxu1 %v250_v33  ;;  %v239_v44 = vld [vmem:[#allocation7 + $0xa0] sm:$0xff]  ;;  %v238_v45 = vld [vmem:[#allocation7 + $0x98] sm:$0xff]  ;;  %v237_v46 = vld [vmem:[#allocation7 + $0x90] sm:$0xff] }
  0x35   :  { %1498 = vmatprep.subr.mxu0 %v2044_v15  ;;  %1546 = vmatprep.subr.mxu1 %v249_v34 }
  0x36   :  { %93 = vadd.xlane.f32.xlu1 %v2037_v13  ;;  %91 = vadd.xlane.f32.xlu0 %v2039_v14 }
  0x37   :  { %1499 = vmatpush3.msra.mxu0 %v2044_v15  ;;  %1547 = vmatpush3.msra.mxu1 %v249_v34 }
  0x38   :  { %1500 = vmatprep.subr.mxu0 %v2054_v18  ;;  %1548 = vmatprep.subr.mxu1 %v248_v35 }
  0x39   :  { %1501 = vmatpush3.msra.mxu0 %v2054_v18  ;;  %1549 = vmatpush3.msra.mxu1 %v248_v35 }
  0x3a   :  { %97 = vadd.xlane.f32.xlu1 %v2048_v16  ;;  %95 = vadd.xlane.f32.xlu0 %v2050_v17 }
  0x3b   :  { %1502 = vmatprep.subr.mxu0 %v2059_v19  ;;  %1550 = vmatprep.subr.mxu1 %v247_v36 }
  0x3c   :  { %1503 = vmatpush3.msra.mxu0 %v2059_v19  ;;  %1551 = vmatpush3.msra.mxu1 %v247_v36 }
  0x3d   :  { %1504 = vmatprep.subr.mxu0 %v2068_v22  ;;  %1552 = vmatprep.subr.mxu1 %v246_v37 }
  0x3e   :  { %101 = vadd.xlane.f32.xlu1 %v2061_v20  ;;  %99 = vadd.xlane.f32.xlu0 %v2063_v21 }
  0x3f   :  { %1505 = vmatpush3.msra.mxu0 %v2068_v22  ;;  %1553 = vmatpush3.msra.mxu1 %v246_v37 }
  0x40   :  { %1506 = vmatprep.subr.mxu0 %v2078_v25  ;;  %1554 = vmatprep.subr.mxu1 %v245_v38 }
  0x41   :  { %1507 = vmatpush3.msra.mxu0 %v2078_v25  ;;  %1555 = vmatpush3.msra.mxu1 %v245_v38 }
  0x42   :  { %105 = vadd.xlane.f32.xlu1 %v2072_v23  ;;  %103 = vadd.xlane.f32.xlu0 %v2074_v24 }
  0x43   :  { %1508 = vmatprep.subr.mxu0 %v2083_v26  ;;  %1556 = vmatprep.subr.mxu1 %v244_v39 }
  0x44   :  { %1509 = vmatpush3.msra.mxu0 %v2083_v26  ;;  %1557 = vmatpush3.msra.mxu1 %v244_v39 }
  0x45   :  { %1510 = vmatprep.subr.mxu0 %v2087_v27  ;;  %1558 = vmatprep.subr.mxu1 %v243_v40 }
  0x46   :  { %1511 = vmatpush3.msra.mxu0 %v2087_v27  ;;  %1559 = vmatpush3.msra.mxu1 %v243_v40 }
  0x47   :  { %1512 = vmatprep.subr.mxu0 %v2091_v28  ;;  %1560 = vmatprep.subr.mxu1 %v242_v41 }
  0x48   :  { %1513 = vmatpush3.msra.mxu0 %v2091_v28  ;;  %1561 = vmatpush3.msra.mxu1 %v242_v41 }
  0x49   :  { %1514 = vmatprep.subr.mxu0 %v2095_v29  ;;  %1562 = vmatprep.subr.mxu1 %v241_v42 }
  0x4a   :  { %1515 = vmatpush3.msra.mxu0 %v2095_v29  ;;  %1563 = vmatpush3.msra.mxu1 %v241_v42 }
  0x4b   :  { %1516 = vmatprep.subr.mxu0 %v2099_v30  ;;  %1564 = vmatprep.subr.mxu1 %v240_v43 }
  0x4c   :  { %1517 = vmatpush3.msra.mxu0 %v2099_v30  ;;  %1565 = vmatpush3.msra.mxu1 %v240_v43 }
  0x4d   :  { %1518 = vmatprep.subr.mxu0 %v2103_v31  ;;  %1566 = vmatprep.subr.mxu1 %v239_v44 }
  0x4e   :  { %1519 = vmatpush3.msra.mxu0 %v2103_v31  ;;  %1567 = vmatpush3.msra.mxu1 %v239_v44 }
  0x4f   :  { %1600 = vmatprep.subr.mxu0 %v2109_v32  ;;  %1568 = vmatprep.subr.mxu1 %v238_v45 }
  0x50   :  { %1569 = vmatpush3.msra.mxu1 %v238_v45 }
  0x51   :  { %1570 = vmatprep.subr.mxu1 %v237_v46 }
  0x52   :  { %1571 = vmatpush3.msra.mxu1 %v237_v46 }
  0xaf   :  { %v80_v47 = vpop.xlane.xlu1 %79  ;;  %v76_v48 = vpop.xlane.xlu0 %75 }
  0xb0   :  { %v125_v49 = vmax.f32 %v80_v47, 1.0  ;;  %v123_v50 = vmax.f32 %v76_v48, 1.0  ;;  %vm107_vm0 = vcmp.gt.f32.partialorder %v76_v48, 0.0  ;;  %vm109_vm1 = vcmp.gt.f32.partialorder %v80_v47, 0.0 }
  0xb2   :  { %1830 = vrcp.f32 %v123_v50 }
  0xb3   :  { %v82_v51 = vpop.xlane.xlu1 %81  ;;  %v78_v52 = vpop.xlane.xlu0 %77  ;;  %1832 = vrcp.f32 %v125_v49 }
  0xb4   :  { %v126_v53 = vmax.f32 %v82_v51, 1.0  ;;  %v124_v54 = vmax.f32 %v78_v52, 1.0  ;;  %vm108_vm2 = vcmp.gt.f32.partialorder %v78_v52, 0.0  ;;  %vm110_vm3 = vcmp.gt.f32.partialorder %v82_v51, 0.0 }
  0xb6   :  { %1834 = vrcp.f32 %v126_v53 }
  0xb7   :  { %1836 = vrcp.f32 %v124_v54  ;;  %v86_v55 = vpop.xlane.xlu1 %85  ;;  %v84_v56 = vpop.xlane.xlu0 %83  ;;  %v233_v54 = vld [vmem:[#allocation7 + $0x70] sm:$0xff] }
  0xb8   :  { %v128_v57 = vmax.f32 %v86_v55, 1.0  ;;  %v127_v58 = vmax.f32 %v84_v56, 1.0  ;;  %vm111_vm4 = vcmp.gt.f32.partialorder %v84_v56, 0.0  ;;  %vm112_vm5 = vcmp.gt.f32.partialorder %v86_v55, 0.0 }
  0xba   :  { %1838 = vrcp.f32 %v128_v57 }
  0xbb   :  { %1840 = vrcp.f32 %v127_v58  ;;  %v2112_v59 = vpop.xlane.xlu1 %89  ;;  %v2114_v60 = vpop.xlane.xlu0 %87 }
  0xbc   :  { %v130_v61 = vmax.f32 %v2112_v59, 1.0  ;;  %v129_v62 = vmax.f32 %v2114_v60, 1.0  ;;  %vm113_vm6 = vcmp.gt.f32.partialorder %v2114_v60, 0.0  ;;  %vm114_vm7 = vcmp.gt.f32.partialorder %v2112_v59, 0.0  ;;  %v228_v59 = vld [vmem:[#allocation7 + $0x48] sm:$0xff] }
  0xbe   :  { %1842 = vrcp.f32 %v130_v61 }
  0xbf   :  { %1844 = vrcp.f32 %v129_v62  ;;  %v2118_v63 = vpop.xlane.xlu1 %93  ;;  %v2120_v33 = vpop.xlane.xlu0 %91 }
  0xc0   :  { %v1831_v34 = vpop.eup %1830  ;;  %v132_v35 = vmax.f32 %v2118_v63, 1.0  ;;  %v131_v37 = vmax.f32 %v2120_v33, 1.0  ;;  %vm115_vm8 = vcmp.gt.f32.partialorder %v2120_v33, 0.0  ;;  %vm116_vm9 = vcmp.gt.f32.partialorder %v2118_v63, 0.0  ;;  %v227_v33 = vld [vmem:[#allocation7 + $0x40] sm:$0xff] }
  0xc1   :  { %v1833_v36 = vpop.eup %1832  ;;  %v171_v38 = vsel %vm107_vm0, %v1831_v34, 0.0 }
  0xc2   :  { %1846 = vrcp.f32 %v132_v35  ;;  %v2125_v39 = vmul.f32 %v171_v38, %v1999_v1  ;;  %v173_v44 = vsel %vm109_vm1, %v1833_v36, 0.0  ;;  %v230_v38 = vld [vmem:[#allocation7 + $0x58] sm:$0xff] }
  0xc3   :  { %v1835_v40 = vpop.eup %1834  ;;  %1848 = vrcp.f32 %v131_v37  ;;  %v2127_v41 = vpop.xlane.xlu1 %97  ;;  %v2138_v49 = vmul.f32 %v173_v44, %v1997_v0  ;;  %v232_v0 = vld [vmem:[#allocation7 + $0x68] sm:$0xff]  ;;  %v231_v37 = vld [vmem:[#allocation7 + $0x60] sm:$0xff] }
  0xc4   :  { %v2129_v42 = vpop.xlane.xlu0 %95  ;;  %v1837_v43 = vpop.eup %1836  ;;  %v134_v45 = vmax.f32 %v2127_v41, 1.0  ;;  %1520 = vmatprep.mubr.f32.mxu0 %v2125_v39  ;;  %v174_v50 = vsel %vm110_vm3, %v1835_v40, 0.0  ;;  %vm118_vm11 = vcmp.gt.f32.partialorder %v2127_v41, 0.0 }
  0xc5   :  { %v172_v46 = vsel %vm108_vm2, %v1837_v43, 0.0  ;;  %v133_v48 = vmax.f32 %v2129_v42, 1.0  ;;  %v2150_v61 = vmul.f32 %v174_v50, %v2003_v2  ;;  %vm117_vm10 = vcmp.gt.f32.partialorder %v2129_v42, 0.0  ;;  %v225_v42 = vld [vmem:[#allocation7 + $0x30] sm:$0xff] }
  0xc6   :  { %v2135_v1 = vmul.f32 %v172_v46, %v2005_v3  ;;  %1850 = vrcp.f32 %v134_v45  ;;  %v229_v45 = vld [vmem:[#allocation7 + $0x50] sm:$0xff] }
  0xc7   :  { %v1839_v47 = vpop.eup %1838  ;;  %1852 = vrcp.f32 %v133_v48  ;;  %v2140_v53 = vpop.xlane.xlu1 %101 }
  0xc8   :  { %v2142_v52 = vpop.xlane.xlu0 %99  ;;  %v1841_v57 = vpop.eup %1840  ;;  %v136_v58 = vmax.f32 %v2140_v53, 1.0  ;;  %1521 = vmatmul.mubr.f32.vlgmr.msra.gmra.mxu0 %v2135_v1  ;;  %v176_v34 = vsel %vm112_vm5, %v1839_v47, 0.0  ;;  %vm120_vm13 = vcmp.gt.f32.partialorder %v2140_v53, 0.0 }
  0xc9   :  { %v175_v3 = vsel %vm111_vm4, %v1841_v57, 0.0  ;;  %v135_v51 = vmax.f32 %v2142_v52, 1.0  ;;  %1523 = vmatprep.mubr.f32.mxu0 %v2138_v49  ;;  %1601 = vmatpush3.msra.mxu0 %v2109_v32  ;;  %v2165_v40 = vmul.f32 %v176_v34, %v2013_v6  ;;  %vm119_vm12 = vcmp.gt.f32.partialorder %v2142_v52, 0.0  ;;  %v223_v52 = vld [vmem:[#allocation7 + $0x20] sm:$0xff] }
  0xca   :  { %v2153_v62 = vmul.f32 %v175_v3, %v2015_v7  ;;  %1854 = vrcp.f32 %v136_v58  ;;  %1602 = vmatprep.subr.mxu0 %v233_v54 }
  0xcb   :  { %v1843_v56 = vpop.eup %1842  ;;  %1856 = vrcp.f32 %v135_v51  ;;  %v2155_v35 = vpop.xlane.xlu1 %105  ;;  %1603 = vmatpush3.msra.mxu0 %v233_v54 }
  0xcc   :  { %v2157_v36 = vpop.xlane.xlu0 %103  ;;  %v1845_v32 = vpop.eup %1844  ;;  %v138_v2 = vmax.f32 %v2155_v35, 1.0  ;;  %1524 = vmatmul.mubr.f32.gmra.mxu0 %v2150_v61  ;;  %1604 = vmatprep.subr.mxu0 %v232_v0  ;;  %v178_v44 = vsel %vm114_vm7, %v1843_v56, 0.0  ;;  %vm122_vm15 = vcmp.gt.f32.partialorder %v2155_v35, 0.0  ;;  %v235_v35 = vld [vmem:[#allocation7 + $0x80] sm:$0xff] }
  0xcd   :  { %v177_v7 = vsel %vm113_vm6, %v1845_v32, 0.0  ;;  %v137_v55 = vmax.f32 %v2157_v36, 1.0  ;;  %1526 = vmatprep.mubr.f32.mxu0 %v2153_v62  ;;  %1605 = vmatpush3.msra.mxu0 %v232_v0  ;;  %vm121_vm14 = vcmp.gt.f32.partialorder %v2157_v36, 0.0  ;;  %v221_v36 = vld [vmem:[#allocation7 + $0x10] sm:$0xff] }
  0xce   :  { %v2169_v43 = vmul.f32 %v177_v7, %v2026_v10  ;;  %1858 = vrcp.f32 %v138_v2  ;;  %1606 = vmatprep.subr.mxu0 %v231_v37  ;;  %v2175_v10 = vmul.f32 %v178_v44, %v2024_v9  ;;  %v226_v9 = vld [vmem:[#allocation7 + $0x38] sm:$0xff]  ;;  %v220_v7 = vld [vmem:[#allocation7 + $0x8] sm:$0xff] }
  0xcf   :  { %v1847_v60 = vpop.eup %1846  ;;  %1860 = vrcp.f32 %v137_v55  ;;  %1607 = vmatpush3.msra.mxu0 %v231_v37 }
  0xd0   :  { %v1849_v46 = vpop.eup %1848  ;;  %1527 = vmatmul.mubr.f32.gmra.mxu0 %v2165_v40  ;;  %1608 = vmatprep.subr.mxu0 %v230_v38  ;;  %v180_v50 = vsel %vm116_vm9, %v1847_v60, 0.0 }
  0xd1   :  { %v179_v6 = vsel %vm115_vm8, %v1849_v46, 0.0  ;;  %1529 = vmatprep.mubr.f32.mxu0 %v2169_v43  ;;  %1609 = vmatpush3.msra.mxu0 %v230_v38  ;;  %v2185_v63 = vmul.f32 %v180_v50, %v2037_v13  ;;  %v224_v13 = vld [vmem:[#allocation7 + $0x28] sm:$0xff]  ;;  %v771_v50 = vld [vmem:[#allocation7 + $0x1f8] sm:$0xff] }
  0xd2   :  { %v2179_v48 = vmul.f32 %v179_v6, %v2039_v14  ;;  %1610 = vmatprep.subr.mxu0 %v229_v45 }
  0xd3   :  { %v1851_v47 = vpop.eup %1850  ;;  %1611 = vmatpush3.msra.mxu0 %v229_v45 }
  0xd4   :  { %v1853_v54 = vpop.eup %1852  ;;  %1530 = vmatmul.mubr.f32.gmra.mxu0 %v2175_v10  ;;  %1612 = vmatprep.subr.mxu0 %v228_v59  ;;  %v182_v3 = vsel %vm118_vm11, %v1851_v47, 0.0 }
  0xd5   :  { %v181_v57 = vsel %vm117_vm10, %v1853_v54, 0.0  ;;  %1532 = vmatprep.mubr.f32.mxu0 %v2179_v48  ;;  %1613 = vmatpush3.msra.mxu0 %v228_v59  ;;  %v2195_v41 = vmul.f32 %v182_v3, %v2048_v16  ;;  %v222_v16 = vld [vmem:[#allocation7 + $0x18] sm:$0xff] }
  0xd6   :  { %v2189_v14 = vmul.f32 %v181_v57, %v2050_v17  ;;  %1614 = vmatprep.subr.mxu0 %v227_v33  ;;  %v769_v57 = vld [vmem:[#allocation7 + $0x1e8] sm:$0xff] }
  0xd7   :  { %v1855_v58 = vpop.eup %1854  ;;  %1615 = vmatpush3.msra.mxu0 %v227_v33 }
  0xd8   :  { %v1857_v51 = vpop.eup %1856  ;;  %1533 = vmatmul.mubr.f32.gmra.mxu0 %v2185_v63  ;;  %1616 = vmatprep.subr.mxu0 %v226_v9  ;;  %v184_v34 = vsel %vm120_vm13, %v1855_v58, 0.0  ;;  %v768_v58 = vld [vmem:[#allocation7 + $0x1e0] sm:$0xff] }
  0xd9   :  { %v183_v0 = vsel %vm119_vm12, %v1857_v51, 0.0  ;;  %1535 = vmatprep.mubr.f32.mxu0 %v2189_v14  ;;  %1617 = vmatpush3.msra.mxu0 %v226_v9  ;;  %v2205_v53 = vmul.f32 %v184_v34, %v2061_v20  ;;  %v236_v20 = vld [vmem:[#allocation7 + $0x88] sm:$0xff]  ;;  %v767_v51 = vld [vmem:[#allocation7 + $0x1d8] sm:$0xff] }
  0xda   :  { %v2199_v17 = vmul.f32 %v183_v0, %v2063_v21  ;;  %1618 = vmatprep.subr.mxu0 %v225_v42  ;;  %1572 = vmatprep.subr.mxu1 %v236_v20 }
  0xdb   :  { %v1859_v56 = vpop.eup %1858  ;;  %1619 = vmatpush3.msra.mxu0 %v225_v42  ;;  %1573 = vmatpush3.msra.mxu1 %v236_v20  ;;  %v762_v20 = vld [vmem:[#allocation7 + $0x1b0] sm:$0xff] }
  0xdc   :  { %v1861_v37 = vpop.eup %1860  ;;  %1536 = vmatmul.mubr.f32.gmra.mxu0 %v2195_v41  ;;  %1620 = vmatprep.subr.mxu0 %v224_v13  ;;  %v186_v2 = vsel %vm122_vm15, %v1859_v56, 0.0 }
  0xdd   :  { %v185_v32 = vsel %vm121_vm14, %v1861_v37, 0.0  ;;  %1538 = vmatprep.mubr.f32.mxu0 %v2199_v17  ;;  %1621 = vmatpush3.msra.mxu0 %v224_v13  ;;  %v2214_v55 = vmul.f32 %v186_v2, %v2072_v23  ;;  %v766_v13 = vld [vmem:[#allocation7 + $0x1d0] sm:$0xff] }
  0xde   :  { %v2209_v21 = vmul.f32 %v185_v32, %v2074_v24  ;;  %1622 = vmatprep.subr.mxu0 %v223_v52  ;;  %v219_v24 = vld [vmem:[#allocation7] sm:$0xff]  ;;  %1574 = vmatprep.subr.mxu1 %v235_v35 }
  0xdf   :  { %1623 = vmatpush3.msra.mxu0 %v223_v52  ;;  %1575 = vmatpush3.msra.mxu1 %v235_v35  ;;  %v765_v52 = vld [vmem:[#allocation7 + $0x1c8] sm:$0xff]  ;;  %v764_v32 = vld [vmem:[#allocation7 + $0x1c0] sm:$0xff] }
  0xe0   :  { %1539 = vmatmul.mubr.f32.gmra.mxu0 %v2205_v53  ;;  %1624 = vmatprep.subr.mxu0 %v222_v16 }
  0xe1   :  { %1541 = vmatprep.mubr.f32.mxu0 %v2209_v21  ;;  %1625 = vmatpush3.msra.mxu0 %v222_v16 }
  0xe2   :  { %1626 = vmatprep.subr.mxu0 %v221_v36 }
  0xe3   :  { %1627 = vmatpush3.msra.mxu0 %v221_v36  ;;  %v763_v36 = vld [vmem:[#allocation7 + $0x1b8] sm:$0xff] }
  0xe4   :  { %1542 = vmatmul.mubr.f32.gmra.mxu0 %v2214_v55  ;;  %1628 = vmatprep.subr.mxu0 %v220_v7 }
  0xe5   :  { %1629 = vmatpush3.msra.mxu0 %v220_v7  ;;  %1632 = vmatprep.mubr.f32.mxu0 %v2103_v31 }
  0xe6   :  { %1630 = vmatprep.subr.mxu0 %v219_v24 }
  0xe7   :  { %1631 = vmatpush3.msra.mxu0 %v219_v24 }
  0xe8   :  { %1633 = vmatmul.mubr.f32.vlgmr.msra.gmra.mxu0 %v2099_v30  ;;  %1712 = vmatprep.subr.mxu0 %v771_v50 }
  0xe9   :  { %1635 = vmatprep.mubr.f32.mxu0 %v2095_v29  ;;  %1713 = vmatpush3.msra.mxu0 %v771_v50 }
  0xec   :  { %1636 = vmatmul.mubr.f32.gmra.mxu0 %v2091_v28 }
  0xed   :  { %1638 = vmatprep.mubr.f32.mxu0 %v2087_v27 }
  0xf0   :  { %1639 = vmatmul.mubr.f32.gmra.mxu0 %v2083_v26 }
  0xf1   :  { %1641 = vmatprep.mubr.f32.mxu0 %v2078_v25 }
  0xf4   :  { %1642 = vmatmul.mubr.f32.gmra.mxu0 %v2068_v22 }
  0xf5   :  { %1644 = vmatprep.mubr.f32.mxu0 %v2059_v19 }
  0xf8   :  { %1645 = vmatmul.mubr.f32.gmra.mxu0 %v2054_v18 }
  0xf9   :  { %1647 = vmatprep.mubr.f32.mxu0 %v2044_v15 }
  0xfc   :  { %1648 = vmatmul.mubr.f32.gmra.mxu0 %v2035_v12 }
  0xfd   :  { %1650 = vmatprep.mubr.f32.mxu0 %v2030_v11 }
 0x100   :  { %1651 = vmatmul.mubr.f32.gmra.mxu0 %v2020_v8 }
 0x101   :  { %1653 = vmatprep.mubr.f32.mxu0 %v2011_v5 }
 0x104   :  { %1654 = vmatmul.mubr.f32.gmra.mxu0 %v2009_v4 }
 0x188   :  { %v1522_v23 = vpop.f32.mrf.mxu0 }
 0x18a   :  { %v318_v25 = vpop.f32.mrf.mxu0 }
 0x18b   :  { %1576 = vmatprep.mubr.f32.mxu1 %v318_v25 }
 0x18c   :  { %v1525_v22 = vpop.f32.mrf.mxu0  ;;  %1577 = vmatmul.mubr.f32.vlgmr.msra.gmra.mxu1 %v1522_v23  ;;  %v761_v23 = vld [vmem:[#allocation7 + $0x1a8] sm:$0xff] }
 0x18e   :  { %v328_v19 = vpop.f32.mrf.mxu0 }
 0x18f   :  { %1579 = vmatprep.mubr.f32.mxu1 %v328_v19 }
 0x190   :  { %v1528_v18 = vpop.f32.mrf.mxu0  ;;  %1580 = vmatmul.mubr.f32.gmra.mxu1 %v1525_v22  ;;  %v760_v22 = vld [vmem:[#allocation7 + $0x1a0] sm:$0xff] }
 0x192   :  { %v338_v15 = vpop.f32.mrf.mxu0 }
 0x193   :  { %1582 = vmatprep.mubr.f32.mxu1 %v338_v15  ;;  %v759_v15 = vld [vmem:[#allocation7 + $0x198] sm:$0xff] }
 0x194   :  { %v1531_v12 = vpop.f32.mrf.mxu0  ;;  %1583 = vmatmul.mubr.f32.gmra.mxu1 %v1528_v18 }
 0x196   :  { %v348_v11 = vpop.f32.mrf.mxu0 }
 0x197   :  { %1585 = vmatprep.mubr.f32.mxu1 %v348_v11  ;;  %v758_v11 = vld [vmem:[#allocation7 + $0x190] sm:$0xff] }
 0x198   :  { %v1534_v8 = vpop.f32.mrf.mxu0  ;;  %1586 = vmatmul.mubr.f32.gmra.mxu1 %v1531_v12 }
 0x19a   :  { %v358_v5 = vpop.f32.mrf.mxu0 }
 0x19b   :  { %1588 = vmatprep.mubr.f32.mxu1 %v358_v5 }
 0x19c   :  { %v1537_v4 = vpop.f32.mrf.mxu0  ;;  %1589 = vmatmul.mubr.f32.gmra.mxu1 %v1534_v8 }
 0x19e   :  { %v368_v26 = vpop.f32.mrf.mxu0 }
 0x19f   :  { %1591 = vmatprep.mubr.f32.mxu1 %v368_v26 }
 0x1a0   :  { %v1540_v27 = vpop.f32.mrf.mxu0  ;;  %1592 = vmatmul.mubr.f32.gmra.mxu1 %v1537_v4 }
 0x1a2   :  { %v378_v28 = vpop.f32.mrf.mxu0 }
 0x1a3   :  { %1594 = vmatprep.mubr.f32.mxu1 %v378_v28 }
 0x1a4   :  { %v1543_v29 = vpop.f32.mrf.mxu0  ;;  %1595 = vmatmul.mubr.f32.gmra.mxu1 %v1540_v27 }
 0x1a6   :  { %v388_v30 = vpop.f32.mrf.mxu0 }
 0x1a7   :  { %1597 = vmatprep.mubr.f32.mxu1 %v388_v30 }
 0x1a8   :  { %1598 = vmatmul.mubr.f32.gmra.mxu1 %v1543_v29  ;;  %v2234_v31 = vpop.f32.mrf.mxu0  ;;  %v2273_v29 = vld [vmem:[%s2434_s3] ss:$0 sm:$0xff] }
 0x1a9   :  { %1688 = vmatprep.mubr.f32.mxu1 %v2125_v39  ;;  %v770_v39 = vld [vmem:[#allocation7 + $0x1f0] sm:$0xff] }
 0x1aa   :  { %v2236_v38 = vpop.f32.mrf.mxu0  ;;  %1714 = vmatprep.subr.mxu0 %v770_v39 }
 0x1ab   :  { %1715 = vmatpush3.msra.mxu0 %v770_v39 }
 0x1ac   :  { %v2238_v60 = vpop.f32.mrf.mxu0  ;;  %1716 = vmatprep.subr.mxu0 %v769_v57 }
 0x1ad   :  { %1717 = vmatpush3.msra.mxu0 %v769_v57 }
 0x1ae   :  { %v2240_v44 = vpop.f32.mrf.mxu0  ;;  %1718 = vmatprep.subr.mxu0 %v768_v58 }
 0x1af   :  { %1719 = vmatpush3.msra.mxu0 %v768_v58 }
 0x1b0   :  { %v2242_v45 = vpop.f32.mrf.mxu0  ;;  %1720 = vmatprep.subr.mxu0 %v767_v51 }
 0x1b1   :  { %1721 = vmatpush3.msra.mxu0 %v767_v51 }
 0x1b2   :  { %v2244_v46 = vpop.f32.mrf.mxu0  ;;  %1722 = vmatprep.subr.mxu0 %v766_v13 }
 0x1b3   :  { %1723 = vmatpush3.msra.mxu0 %v766_v13 }
 0x1b4   :  { %v2246_v6 = vpop.f32.mrf.mxu0  ;;  %1724 = vmatprep.subr.mxu0 %v765_v52 }
 0x1b5   :  { %1725 = vmatpush3.msra.mxu0 %v765_v52 }
 0x1b6   :  { %v2248_v59 = vpop.f32.mrf.mxu0  ;;  %1726 = vmatprep.subr.mxu0 %v764_v32 }
 0x1b7   :  { %1727 = vmatpush3.msra.mxu0 %v764_v32 }
 0x1b8   :  { %v2254_v54 = vpop.f32.mrf.mxu0  ;;  %1728 = vmatprep.subr.mxu0 %v763_v36 }
 0x1b9   :  { %1729 = vmatpush3.msra.mxu0 %v763_v36 }
 0x1ba   :  { %v2260_v42 = vpop.f32.mrf.mxu0  ;;  %1730 = vmatprep.subr.mxu0 %v762_v20 }
 0x1bb   :  { %1731 = vmatpush3.msra.mxu0 %v762_v20 }
 0x1bc   :  { %v1649_v34 = vpop.f32.mrf.mxu0  ;;  %1732 = vmatprep.subr.mxu0 %v761_v23 }
 0x1bd   :  { %1733 = vmatpush3.msra.mxu0 %v761_v23 }
 0x1be   :  { %v658_v2 = vpop.f32.mrf.mxu0  ;;  %1734 = vmatprep.subr.mxu0 %v760_v22 }
 0x1bf   :  { %1735 = vmatpush3.msra.mxu0 %v760_v22 }
 0x1c0   :  { %v1652_v35 = vpop.f32.mrf.mxu0  ;;  %1736 = vmatprep.subr.mxu0 %v759_v15 }
 0x1c1   :  { %1737 = vmatpush3.msra.mxu0 %v759_v15 }
 0x1c2   :  { %v668_v18 = vpop.f32.mrf.mxu0  ;;  %1738 = vmatprep.subr.mxu0 %v758_v11 }
 0x1c3   :  { %1739 = vmatpush3.msra.mxu0 %v758_v11 }
 0x1c4   :  { %v1655_v5 = vpop.f32.mrf.mxu0 }
 0x1c6   :  { %v678_v30 = vpop.f32.mrf.mxu0 }
 0x24c   :  { %v2250_v47 = vpop.f32.mrf.mxu1 }
 0x24e   :  { %v2252_v33 = vpop.f32.mrf.mxu1 }
 0x250   :  { %v2256_v9 = vpop.f32.mrf.mxu1 }
 0x252   :  { %v2258_v3 = vpop.f32.mrf.mxu1 }
 0x254   :  { %v2262_v0 = vpop.f32.mrf.mxu1 }
 0x256   :  { %v2264_v56 = vpop.f32.mrf.mxu1 }
 0x258   :  { %v2266_v37 = vpop.f32.mrf.mxu1 }
 0x25a   :  { %v2268_v16 = vpop.f32.mrf.mxu1 }
 0x25c   :  { %v1590_v7 = vpop.f32.mrf.mxu1 }
 0x25d   :  { %v654_v20 = vadd.f32 %v2254_v54, %v1590_v7  ;;  %v644_v54 = vadd.f32 %v2246_v6, %v2266_v37  ;;  %v634_v6 = vadd.f32 %v2242_v45, %v2262_v0  ;;  %v624_v45 = vadd.f32 %v2238_v60, %v2256_v9 }
 0x25e   :  { %v503_v24 = vpop.f32.mrf.mxu1  ;;  %v614_v60 = vadd.f32 %v2234_v31, %v2250_v47 }
 0x25f   :  { %v700_v7 = vadd.f32 %v2273_v29, %v654_v20  ;;  %v698_v37 = vadd.f32 %v2273_v29, %v644_v54  ;;  %v696_v0 = vadd.f32 %v2273_v29, %v634_v6  ;;  %v694_v9 = vadd.f32 %v2273_v29, %v624_v45  ;;  %v752_v54 = vld [vmem:[#allocation7 + $0x160] sm:$0xff] }
 0x260   :  { %v1593_v25 = vpop.f32.mrf.mxu1  ;;  %v692_v31 = vadd.f32 %v2273_v29, %v614_v60 }
 0x261   :  { %v664_v39 = vadd.f32 %v1649_v34, %v1593_v25  ;;  %v649_v34 = vadd.f32 %v2260_v42, %v503_v24  ;;  %v639_v42 = vadd.f32 %v2248_v59, %v2268_v16  ;;  %v629_v59 = vadd.f32 %v2244_v46, %v2264_v56 }
 0x262   :  { %v513_v19 = vpop.f32.mrf.mxu1  ;;  %v619_v46 = vadd.f32 %v2240_v44, %v2258_v3  ;;  %v609_v44 = vadd.f32 %v2236_v38, %v2252_v33  ;;  %v710_v47 = vmul.f32 0.01, %v694_v9 }
 0x263   :  { %v659_v13 = vadd.f32 %v658_v2, %v513_v19  ;;  %v699_v24 = vadd.f32 %v2273_v29, %v649_v34  ;;  %v697_v16 = vadd.f32 %v2273_v29, %v639_v42  ;;  %v695_v56 = vadd.f32 %v2273_v29, %v629_v59  ;;  %v755_v34 = vld [vmem:[#allocation7 + $0x178] sm:$0xff] }
 0x264   :  { %v1596_v12 = vpop.f32.mrf.mxu1  ;;  %v693_v3 = vadd.f32 %v2273_v29, %v619_v46  ;;  %v691_v38 = vadd.f32 %v2273_v29, %v609_v44  ;;  %v2356_v20 = vmax.f32 %v694_v9, %v710_v47 }
 0x265   :  { %v674_v4 = vadd.f32 %v1652_v35, %v1596_v12  ;;  %v702_v35 = vadd.f32 %v2273_v29, %v664_v39  ;;  %v701_v25 = vadd.f32 %v2273_v29, %v659_v13 }
 0x266   :  { %v523_v8 = vpop.f32.mrf.mxu1  ;;  %v709_v33 = vmul.f32 0.01, %v693_v3 }
 0x267   :  { %v669_v27 = vadd.f32 %v668_v18, %v523_v8  ;;  %v704_v57 = vadd.f32 %v2273_v29, %v674_v4  ;;  %v718_v19 = vmul.f32 0.01, %v702_v35  ;;  %v717_v11 = vmul.f32 0.01, %v701_v25 }
 0x268   :  { %v1599_v26 = vpop.f32.mrf.mxu1 }
 0x269   :  { %v684_v28 = vadd.f32 %v1655_v5, %v1599_v26  ;;  %v703_v52 = vadd.f32 %v2273_v29, %v669_v27  ;;  %v720_v23 = vmul.f32 0.01, %v704_v57  ;;  %v716_v5 = vmul.f32 0.01, %v700_v7 }
 0x26a   :  { %v533_v50 = vpop.f32.mrf.mxu1  ;;  %v2307_v4 = vmax.f32 %v702_v35, %v718_v19  ;;  %v715_v26 = vmul.f32 0.01, %v699_v24  ;;  %v2314_v27 = vmax.f32 %v701_v25, %v717_v11  ;;  %v707_v35 = vmul.f32 0.01, %v691_v38  ;;  %v754_v25 = vld [vmem:[#allocation7 + $0x170] sm:$0xff] }
 0x26b   :  { %v706_v58 = vadd.f32 %v2273_v29, %v684_v28  ;;  %v679_v51 = vadd.f32 %v678_v30, %v533_v50  ;;  %v719_v15 = vmul.f32 0.01, %v703_v52  ;;  %v2293_v12 = vmax.f32 %v704_v57, %v720_v23  ;;  %v750_v19 = vld [vmem:[#allocation7 + $0x150] sm:$0xff] }
 0x26c   :  { %v714_v28 = vmul.f32 0.01, %v698_v37  ;;  %v2321_v30 = vmax.f32 %v700_v7, %v716_v5  ;;  %v713_v50 = vmul.f32 0.01, %v697_v16  ;;  %v2328_v39 = vmax.f32 %v699_v24, %v715_v26  ;;  %v751_v7 = vld [vmem:[#allocation7 + $0x158] sm:$0xff] }
 0x26d   :  { %v722_v32 = vmul.f32 0.01, %v706_v58  ;;  %v705_v36 = vadd.f32 %v2273_v29, %v679_v51  ;;  %v2300_v8 = vmax.f32 %v703_v52, %v719_v15  ;;  %v712_v57 = vmul.f32 0.01, %v696_v0  ;;  %v753_v15 = vld [vmem:[#allocation7 + $0x168] sm:$0xff] }
 0x26e   :  { %v711_v51 = vmul.f32 0.01, %v695_v56  ;;  %v2342_v13 = vmax.f32 %v697_v16, %v713_v50  ;;  %v2360_v23 = vmax.f32 %v693_v3, %v709_v33  ;;  %v2407_v50 = vld [vmem:[%s2434_s3 + $0x1] ss:$0 sm:$0xff]  ;;  %s1953_s3 = smov [#allocation8]  }
 0x26f   :  { %v721_v22 = vmul.f32 0.01, %v705_v36  ;;  %v2281_v18 = vmax.f32 %v706_v58, %v722_v32  ;;  %v2335_v58 = vmax.f32 %v698_v37, %v714_v28  ;;  %v2347_v52 = vmax.f32 %v696_v0, %v712_v57  ;;  %s1281_s7 = sshll.u32 %s1953_s3, 4  ;;  %s1282_s7 = int_to_ptr.vmem [resolvable:$true] %s1281_s7 }
 0x270   :  { %v2352_v32 = vmax.f32 %v695_v56, %v711_v51  ;;  %s1922_s8 = scalar_lea.vmem %s1282_s7, 2048  ;;  %p1927_p2 = scmp.lt.s32.totalorder %s1282_s7, %s1282_s7 }
 0x271   :  { %1656 = vmatprep.subr.mxu1 %v2281_v18  ;;  %v2286_v2 = vmax.f32 %v705_v36, %v721_v22  ;;  %v708_v36 = vmul.f32 0.01, %v692_v31  ;;  %v2368_v22 = vmax.f32 %v691_v38, %v707_v35  ;;  %p1923_p1 = scmp.ne.s32.totalorder %s1282_s7, %s1922_s8  ;;  %p1928_p3 = scmp.lt.s32.totalorder %s1922_s8, %s1922_s8 }
 0x272   :  { %1657 = vmatpush3.msra.mxu1 %v2281_v18 }
 0x273   :  { %1658 = vmatprep.subr.mxu1 %v2286_v2  ;;  %v2364_v29 = vmax.f32 %v692_v31, %v708_v36  ;;  %p1929_p4 = por %p1928_p3, %p1927_p2 }
 0x274   :  { %1659 = vmatpush3.msra.mxu1 %v2286_v2 }
 0x275   :  { %1660 = vmatprep.subr.mxu1 %v2293_v12  ;;  %p1930_p5 = pnand %p1929_p4, %p1923_p1 }
 0x276   :  { %1661 = vmatpush3.msra.mxu1 %v2293_v12 }
 0x277   :  { %1662 = vmatprep.subr.mxu1 %v2300_v8 }
 0x278   :  { %1663 = vmatpush3.msra.mxu1 %v2300_v8 }
 0x279   :  { %1664 = vmatprep.subr.mxu1 %v2307_v4 }
 0x27a   :  { %1665 = vmatpush3.msra.mxu1 %v2307_v4 }
 0x27b   :  { %1666 = vmatprep.subr.mxu1 %v2314_v27 }
 0x27c   :  { %1667 = vmatpush3.msra.mxu1 %v2314_v27 }
 0x27d   :  { %1668 = vmatprep.subr.mxu1 %v2321_v30 }
 0x27e   :  { %1669 = vmatpush3.msra.mxu1 %v2321_v30 }
 0x27f   :  { %1670 = vmatprep.subr.mxu1 %v2328_v39 }
 0x280   :  { %1671 = vmatpush3.msra.mxu1 %v2328_v39 }
 0x281   :  { %1672 = vmatprep.subr.mxu1 %v2335_v58 }
 0x282   :  { %1673 = vmatpush3.msra.mxu1 %v2335_v58 }
 0x283   :  { %1674 = vmatprep.subr.mxu1 %v2342_v13 }
 0x284   :  { %1675 = vmatpush3.msra.mxu1 %v2342_v13 }
 0x285   :  { %1676 = vmatprep.subr.mxu1 %v2347_v52 }
 0x286   :  { %1677 = vmatpush3.msra.mxu1 %v2347_v52 }
 0x287   :  { %1678 = vmatprep.subr.mxu1 %v2352_v32 }
 0x288   :  { %1679 = vmatpush3.msra.mxu1 %v2352_v32 }
 0x289   :  { %1680 = vmatprep.subr.mxu1 %v2356_v20 }
 0x28a   :  { %1681 = vmatpush3.msra.mxu1 %v2356_v20 }
 0x28b   :  { %1682 = vmatprep.subr.mxu1 %v2360_v23 }
 0x28c   :  { %1683 = vmatpush3.msra.mxu1 %v2360_v23 }
 0x28d   :  { %1684 = vmatprep.subr.mxu1 %v2364_v29 }
 0x28e   :  { %1685 = vmatpush3.msra.mxu1 %v2364_v29 }
 0x28f   :  { %1686 = vmatprep.subr.mxu1 %v2368_v22 }
 0x290   :  { %1687 = vmatpush3.msra.mxu1 %v2368_v22 }
 0x291   :  { %1689 = vmatmul.mubr.f32.vlgmr.msra.gmra.mxu1 %v2135_v1  ;;  %1768 = vmatprep.subr.mxu1 %v755_v34  ;;  %v749_v1 = vld [vmem:[#allocation7 + $0x148] sm:$0xff] }
 0x292   :  { %1691 = vmatprep.mubr.f32.mxu1 %v2138_v49  ;;  %1769 = vmatpush3.msra.mxu1 %v755_v34  ;;  %v748_v49 = vld [vmem:[#allocation7 + $0x140] sm:$0xff] }
 0x293   :  { %1770 = vmatprep.subr.mxu1 %v754_v25 }
 0x294   :  { %1771 = vmatpush3.msra.mxu1 %v754_v25 }
 0x295   :  { %1692 = vmatmul.mubr.f32.gmra.mxu1 %v2150_v61  ;;  %1772 = vmatprep.subr.mxu1 %v753_v15  ;;  %v747_v61 = vld [vmem:[#allocation7 + $0x138] sm:$0xff] }
 0x296   :  { %1694 = vmatprep.mubr.f32.mxu1 %v2153_v62  ;;  %1773 = vmatpush3.msra.mxu1 %v753_v15  ;;  %v746_v62 = vld [vmem:[#allocation7 + $0x130] sm:$0xff] }
 0x297   :  { %1774 = vmatprep.subr.mxu1 %v752_v54 }
 0x298   :  { %1775 = vmatpush3.msra.mxu1 %v752_v54 }
 0x299   :  { %1695 = vmatmul.mubr.f32.gmra.mxu1 %v2165_v40  ;;  %1776 = vmatprep.subr.mxu1 %v751_v7  ;;  %v745_v40 = vld [vmem:[#allocation7 + $0x128] sm:$0xff] }
 0x29a   :  { %1697 = vmatprep.mubr.f32.mxu1 %v2169_v43  ;;  %1777 = vmatpush3.msra.mxu1 %v751_v7  ;;  %v744_v43 = vld [vmem:[#allocation7 + $0x120] sm:$0xff] }
 0x29b   :  { %1778 = vmatprep.subr.mxu1 %v750_v19 }
 0x29c   :  { %1779 = vmatpush3.msra.mxu1 %v750_v19 }
 0x29d   :  { %1698 = vmatmul.mubr.f32.gmra.mxu1 %v2175_v10  ;;  %1780 = vmatprep.subr.mxu1 %v749_v1  ;;  %v743_v10 = vld [vmem:[#allocation7 + $0x118] sm:$0xff] }
 0x29e   :  { %1700 = vmatprep.mubr.f32.mxu1 %v2179_v48  ;;  %1781 = vmatpush3.msra.mxu1 %v749_v1  ;;  %v742_v48 = vld [vmem:[#allocation7 + $0x110] sm:$0xff] }
 0x29f   :  { %1782 = vmatprep.subr.mxu1 %v748_v49 }
 0x2a0   :  { %1783 = vmatpush3.msra.mxu1 %v748_v49 }
 0x2a1   :  { %1701 = vmatmul.mubr.f32.gmra.mxu1 %v2185_v63  ;;  %1784 = vmatprep.subr.mxu1 %v747_v61  ;;  %v741_v63 = vld [vmem:[#allocation7 + $0x108] sm:$0xff] }
 0x2a2   :  { %1703 = vmatprep.mubr.f32.mxu1 %v2189_v14  ;;  %1785 = vmatpush3.msra.mxu1 %v747_v61  ;;  %v740_v14 = vld [vmem:[#allocation7 + $0x100] sm:$0xff] }
 0x2a3   :  { %1786 = vmatprep.subr.mxu1 %v746_v62 }
 0x2a4   :  { %1787 = vmatpush3.msra.mxu1 %v746_v62 }
 0x2a5   :  { %1704 = vmatmul.mubr.f32.gmra.mxu1 %v2195_v41  ;;  %1788 = vmatprep.subr.mxu1 %v745_v40  ;;  %v757_v41 = vld [vmem:[#allocation7 + $0x188] sm:$0xff] }
 0x2a6   :  { %1706 = vmatprep.mubr.f32.mxu1 %v2199_v17  ;;  %1789 = vmatpush3.msra.mxu1 %v745_v40  ;;  %v756_v17 = vld [vmem:[#allocation7 + $0x180] sm:$0xff] }
 0x2a7   :  { %1790 = vmatprep.subr.mxu1 %v744_v43  ;;  %1740 = vmatprep.subr.mxu0 %v757_v41 }
 0x2a8   :  { %1791 = vmatpush3.msra.mxu1 %v744_v43  ;;  %1741 = vmatpush3.msra.mxu0 %v757_v41 }
 0x2a9   :  { %1707 = vmatmul.mubr.f32.gmra.mxu1 %v2205_v53  ;;  %1792 = vmatprep.subr.mxu1 %v743_v10 }
 0x2aa   :  { %1709 = vmatprep.mubr.f32.mxu1 %v2209_v21  ;;  %1793 = vmatpush3.msra.mxu1 %v743_v10 }
 0x2ab   :  { %1794 = vmatprep.subr.mxu1 %v742_v48  ;;  %1742 = vmatprep.subr.mxu0 %v756_v17 }
 0x2ac   :  { %1795 = vmatpush3.msra.mxu1 %v742_v48  ;;  %1743 = vmatpush3.msra.mxu0 %v756_v17 }
 0x2ad   :  { %1710 = vmatmul.mubr.f32.gmra.mxu1 %v2214_v55  ;;  %1796 = vmatprep.subr.mxu1 %v741_v63 }
 0x2ae   :  { %1797 = vmatpush3.msra.mxu1 %v741_v63  ;;  %1800 = vmatprep.mubr.f32.mxu1 %v2368_v22 }
 0x2af   :  { %1798 = vmatprep.subr.mxu1 %v740_v14 }
 0x2b0   :  { %1799 = vmatpush3.msra.mxu1 %v740_v14 }
 0x2b1   :  { %1801 = vmatmul.mubr.f32.vlgmr.msra.gmra.mxu1 %v2364_v29 }
 0x2b2   :  { %1803 = vmatprep.mubr.f32.mxu1 %v2360_v23 }
 0x2b5   :  { %1804 = vmatmul.mubr.f32.gmra.mxu1 %v2356_v20 }
 0x2b6   :  { %1806 = vmatprep.mubr.f32.mxu1 %v2352_v32 }
 0x2b9   :  { %1807 = vmatmul.mubr.f32.gmra.mxu1 %v2347_v52 }
 0x2ba   :  { %1809 = vmatprep.mubr.f32.mxu1 %v2342_v13 }
 0x2bd   :  { %1810 = vmatmul.mubr.f32.gmra.mxu1 %v2335_v58 }
 0x2be   :  { %1812 = vmatprep.mubr.f32.mxu1 %v2328_v39 }
 0x2c1   :  { %1813 = vmatmul.mubr.f32.gmra.mxu1 %v2321_v30 }
 0x2c2   :  { %1815 = vmatprep.mubr.f32.mxu1 %v2314_v27 }
 0x2c5   :  { %1816 = vmatmul.mubr.f32.gmra.mxu1 %v2307_v4 }
 0x2c6   :  { %1818 = vmatprep.mubr.f32.mxu1 %v2300_v8 }
 0x2c9   :  { %1819 = vmatmul.mubr.f32.gmra.mxu1 %v2293_v12 }
 0x2ca   :  { %1821 = vmatprep.mubr.f32.mxu1 %v2286_v2 }
 0x2cd   :  { %1822 = vmatmul.mubr.f32.gmra.mxu1 %v2281_v18 }
 0x351   :  { %v1690_v53 = vpop.f32.mrf.mxu1 }
 0x353   :  { %v839_v21 = vpop.f32.mrf.mxu1 }
 0x354   :  { %1744 = vmatprep.mubr.f32.mxu0 %v839_v21 }
 0x355   :  { %v1693_v55 = vpop.f32.mrf.mxu1  ;;  %1745 = vmatmul.mubr.f32.vlgmr.msra.gmra.mxu0 %v1690_v53 }
 0x357   :  { %v849_v42 = vpop.f32.mrf.mxu1 }
 0x358   :  { %1747 = vmatprep.mubr.f32.mxu0 %v849_v42 }
 0x359   :  { %v1696_v24 = vpop.f32.mrf.mxu1  ;;  %1748 = vmatmul.mubr.f32.gmra.mxu0 %v1693_v55 }
 0x35b   :  { %v859_v12 = vpop.f32.mrf.mxu1 }
 0x35c   :  { %1750 = vmatprep.mubr.f32.mxu0 %v859_v12 }
 0x35d   :  { %v1699_v2 = vpop.f32.mrf.mxu1  ;;  %1751 = vmatmul.mubr.f32.gmra.mxu0 %v1696_v24 }
 0x35f   :  { %v869_v18 = vpop.f32.mrf.mxu1 }
 0x360   :  { %1753 = vmatprep.mubr.f32.mxu0 %v869_v18 }
 0x361   :  { %v1702_v11 = vpop.f32.mrf.mxu1  ;;  %1754 = vmatmul.mubr.f32.gmra.mxu0 %v1699_v2 }
 0x363   :  { %v879_v8 = vpop.f32.mrf.mxu1 }
 0x364   :  { %1756 = vmatprep.mubr.f32.mxu0 %v879_v8 }
 0x365   :  { %v1705_v6 = vpop.f32.mrf.mxu1  ;;  %1757 = vmatmul.mubr.f32.gmra.mxu0 %v1702_v11 }
 0x367   :  { %v889_v37 = vpop.f32.mrf.mxu1 }
 0x368   :  { %1759 = vmatprep.mubr.f32.mxu0 %v889_v37 }
 0x369   :  { %v1708_v5 = vpop.f32.mrf.mxu1  ;;  %1760 = vmatmul.mubr.f32.gmra.mxu0 %v1705_v6 }
 0x36b   :  { %v899_v4 = vpop.f32.mrf.mxu1 }
 0x36c   :  { %1762 = vmatprep.mubr.f32.mxu0 %v899_v4 }
 0x36d   :  { %v1711_v59 = vpop.f32.mrf.mxu1  ;;  %1763 = vmatmul.mubr.f32.gmra.mxu0 %v1708_v5 }
 0x36f   :  { %v909_v16 = vpop.f32.mrf.mxu1 }
 0x370   :  { %1765 = vmatprep.mubr.f32.mxu0 %v909_v16 }
 0x371   :  { %1766 = vmatmul.mubr.f32.gmra.mxu0 %v1711_v59  ;;  %v1802_v26 = vpop.f32.mrf.mxu1 }
 0x373   :  { %v1129_v27 = vpop.f32.mrf.mxu1 }
 0x375   :  { %v1805_v45 = vpop.f32.mrf.mxu1 }
 0x377   :  { %v1139_v0 = vpop.f32.mrf.mxu1 }
 0x379   :  { %v1808_v28 = vpop.f32.mrf.mxu1 }
 0x37b   :  { %v1149_v30 = vpop.f32.mrf.mxu1 }
 0x37d   :  { %v1811_v46 = vpop.f32.mrf.mxu1 }
 0x37f   :  { %v1159_v56 = vpop.f32.mrf.mxu1 }
 0x381   :  { %v1814_v9 = vpop.f32.mrf.mxu1 }
 0x383   :  { %v1169_v47 = vpop.f32.mrf.mxu1 }
 0x385   :  { %v1817_v34 = vpop.f32.mrf.mxu1 }
 0x387   :  { %v1179_v43 = vpop.f32.mrf.mxu1 }
 0x389   :  { %v1820_v24 = vpop.f32.mrf.mxu1 }
 0x38b   :  { %v1189_v16 = vpop.f32.mrf.mxu1 }
 0x415   :  { %v1746_v39 = vpop.f32.mrf.mxu0 }
 0x416   :  { %v1135_v60 = vadd.f32 %v1802_v26, %v1746_v39 }
 0x417   :  { %v984_v57 = vpop.f32.mrf.mxu0 }
 0x418   :  { %v1213_v58 = vadd.f32 %v2407_v50, %v1135_v60  ;;  %v1130_v44 = vadd.f32 %v1129_v27, %v984_v57 }
 0x419   :  { %v1749_v3 = vpop.f32.mrf.mxu0 }
 0x41a   :  { %v1229_v51 = vmul.f32 0.01, %v1213_v58  ;;  %v1212_v13 = vadd.f32 %v2407_v50, %v1130_v44  ;;  %v1145_v31 = vadd.f32 %v1805_v45, %v1749_v3 }
 0x41b   :  { %v994_v52 = vpop.f32.mrf.mxu0 }
 0x41c   :  { %v1245_v38 = vmax.f32 %v1213_v58, %v1229_v51  ;;  %v1228_v33 = vmul.f32 0.01, %v1212_v13  ;;  %v1215_v32 = vadd.f32 %v2407_v50, %v1145_v31  ;;  %v1140_v36 = vadd.f32 %v1139_v0, %v994_v52 }
 0x41d   :  { %v1752_v20 = vpop.f32.mrf.mxu0 }
 0x41e   :  { %1261 = vst [vmem:[#allocation8 + $0x8] sm:$0xff] %v1245_v38  ;;  %v1244_v35 = vmax.f32 %v1212_v13, %v1228_v33  ;;  %v1231_v23 = vmul.f32 0.01, %v1215_v32  ;;  %v1214_v29 = vadd.f32 %v2407_v50, %v1140_v36  ;;  %v1155_v22 = vadd.f32 %v1808_v28, %v1752_v20 }
 0x41f   :  { %v1004_v25 = vpop.f32.mrf.mxu0 }
 0x420   :  { %1260 = vst [vmem:[#allocation8] sm:$0xff] %v1244_v35  ;;  %v1247_v15 = vmax.f32 %v1215_v32, %v1231_v23  ;;  %v1230_v54 = vmul.f32 0.01, %v1214_v29  ;;  %v1217_v7 = vadd.f32 %v2407_v50, %v1155_v22  ;;  %v1150_v19 = vadd.f32 %v1149_v30, %v1004_v25 }
 0x421   :  { %v1755_v1 = vpop.f32.mrf.mxu0 }
 0x422   :  { %1263 = vst [vmem:[#allocation8 + $0x18] sm:$0xff] %v1247_v15  ;;  %v1246_v49 = vmax.f32 %v1214_v29, %v1230_v54  ;;  %v1233_v61 = vmul.f32 0.01, %v1217_v7  ;;  %v1216_v62 = vadd.f32 %v2407_v50, %v1150_v19  ;;  %v1165_v40 = vadd.f32 %v1811_v46, %v1755_v1 }
 0x423   :  { %v1014_v10 = vpop.f32.mrf.mxu0 }
 0x424   :  { %1262 = vst [vmem:[#allocation8 + $0x10] sm:$0xff] %v1246_v49  ;;  %v1249_v48 = vmax.f32 %v1217_v7, %v1233_v61  ;;  %v1232_v63 = vmul.f32 0.01, %v1216_v62  ;;  %v1219_v14 = vadd.f32 %v2407_v50, %v1165_v40  ;;  %v1160_v41 = vadd.f32 %v1159_v56, %v1014_v10 }
 0x425   :  { %v1758_v17 = vpop.f32.mrf.mxu0 }
 0x426   :  { %1265 = vst [vmem:[#allocation8 + $0x28] sm:$0xff] %v1249_v48  ;;  %v1248_v53 = vmax.f32 %v1216_v62, %v1232_v63  ;;  %v1235_v21 = vmul.f32 0.01, %v1219_v14  ;;  %v1218_v55 = vadd.f32 %v2407_v50, %v1160_v41  ;;  %v1175_v42 = vadd.f32 %v1814_v9, %v1758_v17  ;;  %v1823_v9 = vpop.f32.mrf.mxu1 }
 0x427   :  { %v1024_v12 = vpop.f32.mrf.mxu0 }
 0x428   :  { %1264 = vst [vmem:[#allocation8 + $0x20] sm:$0xff] %v1248_v53  ;;  %v1251_v2 = vmax.f32 %v1219_v14, %v1235_v21  ;;  %v1234_v18 = vmul.f32 0.01, %v1218_v55  ;;  %v1221_v11 = vadd.f32 %v2407_v50, %v1175_v42  ;;  %v1170_v8 = vadd.f32 %v1169_v47, %v1024_v12  ;;  %v1199_v33 = vpop.f32.mrf.mxu1 }
 0x429   :  { %v1761_v6 = vpop.f32.mrf.mxu0 }
 0x42a   :  { %1267 = vst [vmem:[#allocation8 + $0x38] sm:$0xff] %v1251_v2  ;;  %v1250_v37 = vmax.f32 %v1218_v55, %v1234_v18  ;;  %v1237_v5 = vmul.f32 0.01, %v1221_v11  ;;  %v1220_v4 = vadd.f32 %v2407_v50, %v1170_v8  ;;  %v1185_v59 = vadd.f32 %v1817_v34, %v1761_v6 }
 0x42b   :  { %v1034_v26 = vpop.f32.mrf.mxu0 }
 0x42c   :  { %1266 = vst [vmem:[#allocation8 + $0x30] sm:$0xff] %v1250_v37  ;;  %v1253_v27 = vmax.f32 %v1221_v11, %v1237_v5  ;;  %v1236_v45 = vmul.f32 0.01, %v1220_v4  ;;  %v1223_v0 = vadd.f32 %v2407_v50, %v1185_v59  ;;  %v1180_v28 = vadd.f32 %v1179_v43, %v1034_v26 }
 0x42d   :  { %v1764_v30 = vpop.f32.mrf.mxu0 }
 0x42e   :  { %1269 = vst [vmem:[#allocation8 + $0x48] sm:$0xff] %v1253_v27  ;;  %v1252_v46 = vmax.f32 %v1220_v4, %v1236_v45  ;;  %v1239_v56 = vmul.f32 0.01, %v1223_v0  ;;  %v1222_v39 = vadd.f32 %v2407_v50, %v1180_v28  ;;  %v1195_v60 = vadd.f32 %v1820_v24, %v1764_v30 }
 0x42f   :  { %v1044_v57 = vpop.f32.mrf.mxu0 }
 0x430   :  { %1268 = vst [vmem:[#allocation8 + $0x40] sm:$0xff] %v1252_v46  ;;  %v1255_v58 = vmax.f32 %v1223_v0, %v1239_v56  ;;  %v1238_v44 = vmul.f32 0.01, %v1222_v39  ;;  %v1225_v3 = vadd.f32 %v2407_v50, %v1195_v60  ;;  %v1190_v51 = vadd.f32 %v1189_v16, %v1044_v57 }
 0x431   :  { %v1767_v13 = vpop.f32.mrf.mxu0 }
 0x432   :  { %1271 = vst [vmem:[#allocation8 + $0x58] sm:$0xff] %v1255_v58  ;;  %v1254_v31 = vmax.f32 %v1222_v39, %v1238_v44  ;;  %v1241_v47 = vmul.f32 0.01, %v1225_v3  ;;  %v1224_v52 = vadd.f32 %v2407_v50, %v1190_v51  ;;  %v1205_v38 = vadd.f32 %v1823_v9, %v1767_v13 }
 0x433   :  { %v1054_v32 = vpop.f32.mrf.mxu0 }
 0x434   :  { %1270 = vst [vmem:[#allocation8 + $0x50] sm:$0xff] %v1254_v31  ;;  %v1257_v36 = vmax.f32 %v1225_v3, %v1241_v47  ;;  %v1240_v20 = vmul.f32 0.01, %v1224_v52  ;;  %v1227_v35 = vadd.f32 %v2407_v50, %v1205_v38  ;;  %v1200_v23 = vadd.f32 %v1199_v33, %v1054_v32 }
 0x436   :  { %1273 = vst [vmem:[#allocation8 + $0x68] sm:$0xff] %v1257_v36  ;;  %v1256_v29 = vmax.f32 %v1224_v52, %v1240_v20  ;;  %v1243_v22 = vmul.f32 0.01, %v1227_v35  ;;  %v1226_v34 = vadd.f32 %v2407_v50, %v1200_v23 }
 0x438   :  { %1272 = vst [vmem:[#allocation8 + $0x60] sm:$0xff] %v1256_v29  ;;  %v1259_v25 = vmax.f32 %v1227_v35, %v1243_v22  ;;  %v1242_v15 = vmul.f32 0.01, %v1226_v34 }
 0x43a   :  { %1275 = vst [vmem:[#allocation8 + $0x78] sm:$0xff] %v1259_v25  ;;  %v1258_v54 = vmax.f32 %v1226_v34, %v1242_v15 }
 0x43c   :  { %1274 = vst [vmem:[#allocation8 + $0x70] sm:$0xff] %v1258_v54 }
 0x43d   :  { %1933 = shalt.err (!%p1930_p5)
}
 0x43e   :  { %1287 = dma.vmem_to_hbm [thread:$0]  %s1282_s7, 2048, %s2435_s4, [#allocation4], %s1950_s20, %s1950_s20, %s1951_s21  }
 0x43f   :  { %1946 = dma.done.wait [#allocation4], 2048  }
 0x440   :  { %1947 = vsyncadd [#allocation4], 4294965248 }
 0x441   :  { %1291 = vsyncpa [#allocation3], 1 }
 0x442   :  { %1292 = vsyncpa [#allocation6], 1 }
 0x443   :  { %1293 = vsyncpa [#allocation4], 1 }

</bundles_post_ra>
